<compile_context>
chip_gen: v5e
topology: v5e:2x2
jax: 0.10.0
libtpu: 0.0.40
codegen_flags: <defaults>
</compile_context>

<pallas_src>
import functools

import jax
import jax.numpy as jnp
import numpy as np
from jax import lax
from jax.experimental import pallas as pl
from jax.experimental.pallas import tpu as pltpu


# ---------------------------------------------------------------------------
# Kernels
# ---------------------------------------------------------------------------

def _proj_kernel_acc(x_ref, w_ref, o_ref, acc_ref):
    """(tm,tk) x (tv,tk) contracted on K -> (tm,tv); f32 VMEM accumulator,
    cast to the output dtype at the last K step."""
    @pl.when(pl.program_id(2) == 0)
    def _():
        acc_ref[...] = jnp.zeros_like(acc_ref)

    acc_ref[...] += lax.dot_general(
        x_ref[...],
        w_ref[...],
        dimension_numbers=(((1,), (1,)), ((), ())),   # contract on K, no transpose
        preferred_element_type=jnp.float32,
    )

    @pl.when(pl.program_id(2) == pl.num_programs(2) - 1)
    def _():
        o_ref[...] = acc_ref[...].astype(o_ref.dtype)


def _proj_kernel_f32_out(x_ref, w_ref, o_ref):
    """f32 output: accumulate directly into o_ref (resident across the K axis),
    saving tm*tv*4 bytes of VMEM scratch and the finalize copy."""
    @pl.when(pl.program_id(2) == 0)
    def _():
        o_ref[...] = jnp.zeros_like(o_ref)

    o_ref[...] += lax.dot_general(
        x_ref[...],
        w_ref[...],
        dimension_numbers=(((1,), (1,)), ((), ())),
        preferred_element_type=jnp.float32,
    )


# ---------------------------------------------------------------------------
# Small helpers (all run at trace / init time, not in the kernel)
# ---------------------------------------------------------------------------

def _round_up(x, m):
    return ((x + m - 1) // m) * m


def _pad_axis(arr, axis, target):
    pad = target - arr.shape[axis]
    if pad == 0:
        return arr
    widths = [(0, 0)] * arr.ndim
    widths[axis] = (0, pad)
    return jnp.pad(arr, widths)


def _m_granule(dtype):
    """Sublane-packing granule for the second-to-last dim of x / out tiles."""
    itemsize = np.dtype(dtype).itemsize
    return {4: 8, 2: 16, 1: 32}.get(itemsize, 8)


def _fit_tile(extent, want, granule):
    """Pick a tile <= want (multiple of granule) for an axis of size `extent`.

    Prefers a tile that divides the granule-rounded extent exactly, so the grid
    covers it with no padding and the epilogue slice of the logits is a no-op.
    Falls back to `want` (accepting padding) rather than using a tiny tile."""
    e = _round_up(extent, granule)
    t = min(_round_up(want, granule), e)
    if e % t == 0:
        return t
    cand = (t // granule) * granule
    while cand >= granule:
        if e % cand == 0:
            # Only accept divisors that are not much smaller than the request.
            if cand * 2 >= t:
                return cand
            break
        cand -= granule
    return t


def _vmem_capacity_bytes():
    try:
        return int(pltpu.get_tpu_info().vmem_capacity_bytes)
    except Exception:
        return 64 * 1024 * 1024  # conservative (v7x per-TC size)


def _fit_tiles_to_vmem(tm, tv, tk, in_bytes, out_bytes, budget):
    """Shrink (tm, tv, tk) until the double-buffered footprint fits the budget.
    Footprint: 2*(tm*tk + tv*tk)*in + 2*tm*tv*out + tm*tv*4 (worst-case acc)."""
    def footprint(a, b, c):
        return (2 * (a * c + b * c) * in_bytes
                + 2 * a * b * out_bytes
                + a * b * 4)

    while footprint(tm, tv, tk) > budget:
        if tk > 512:
            tk //= 2
        elif tv > 512:
            tv //= 2
        elif tm > 256:
            tm //= 2
        elif tk > 128:
            tk //= 2
        elif tv > 128:
            tv //= 2
        elif tm > 8:
            tm //= 2
        else:
            break
    return tm, tv, tk


# ---------------------------------------------------------------------------
# Jitted forward (tiles / dtypes are static; tm picked from x's shape at trace)
# ---------------------------------------------------------------------------

@functools.partial(
    jax.jit,
    static_argnames=("vocab", "tm_max", "tv", "tk", "m_granule",
                     "out_dtype", "compute_dtype", "vmem_limit"),
)
def _vocab_projection_fwd(x, weight_prepared, *, vocab, tm_max, tv, tk,
                          m_granule, out_dtype, compute_dtype, vmem_limit):
    *lead, hidden = x.shape
    m = int(np.prod(lead)) if lead else 1
    v_p, k_p = weight_prepared.shape

    out_dt = x.dtype if out_dtype is None else np.dtype(out_dtype)

    x2d = x.reshape(m, hidden)
    if compute_dtype is not None:
        x2d = x2d.astype(compute_dtype)

    # Zero-pad K to the weight's padded hidden extent (mathematically a no-op;
    # the weight was zero-padded once at init).
    x2d = _pad_axis(x2d, 1, k_p)

    # Pick tm at trace time: as big as the VMEM budget allows, clamped to m,
    # preferring a tile that divides m so the epilogue slice is elided.
    tm = _fit_tile(m, tm_max, m_granule)
    m_p = _round_up(m, tm)
    x2d = _pad_axis(x2d, 0, m_p)

    grid = (m_p // tm, v_p // tv, k_p // tk)

    f32_out = np.dtype(out_dt) == np.dtype(np.float32)
    kernel = _proj_kernel_f32_out if f32_out else _proj_kernel_acc
    scratch = [] if f32_out else [pltpu.VMEM((tm, tv), jnp.float32)]

    out = pl.pallas_call(
        kernel,
        out_shape=jax.ShapeDtypeStruct((m_p, v_p), out_dt),
        grid=grid,
        in_specs=[
            # activation tile: (tm, tk) at (mi, ki)
            pl.BlockSpec((tm, tk), lambda mi, vi, ki: (mi, ki)),
            # weight tile: (tv, tk) at (vi, ki) -- the large streamed operand.
            # TODO(synk): try pipeline_mode=pl.Buffered(3) here if the trace
            # still shows exposed DMA after the tile enlargement (count the
            # third tv*tk buffer against the v7x ~48 MiB budget first).
            pl.BlockSpec((tv, tk), lambda mi, vi, ki: (vi, ki)),
        ],
        out_specs=pl.BlockSpec((tm, tv), lambda mi, vi, ki: (mi, vi)),
        scratch_shapes=scratch,
        compiler_params=pltpu.CompilerParams(
            # M and V shard across TensorCores (v7x megacore); K is the reduction.
            dimension_semantics=("parallel", "parallel", "arbitrary"),
            vmem_limit_bytes=int(vmem_limit),
        ),
    )(x2d, weight_prepared)

    # No-op (elided by XLA) when the tiles divide m / vocab exactly.
    out = out[:m, :vocab]
    return out.reshape(*lead, vocab)


# ---------------------------------------------------------------------------
# Module wrapper: weight cast / pad done ONCE at init (not per forward call)
# ---------------------------------------------------------------------------

class VocabParallelProjectionTPU:
    """Pallas-TPU forward of Megatron's VocabParallelProjection
    (tensor_model_parallel_size == 1, sequence_parallel=False, bias=None):
        logits = x @ weight.T

    compute_dtype: optional streaming dtype for x / weight (e.g. jnp.bfloat16);
                   accumulation is always f32.
    out_dtype:     optional logits dtype (e.g. jnp.bfloat16 halves the M x V
                   logits HBM writeback); default keeps x's dtype.
    """

    def __init__(self, weight, *, compute_dtype=None, out_dtype=None,
                 tile_m=1024, tile_v=2048, tile_k=1024):
        vocab, hidden = weight.shape
        self.num_embeddings = int(vocab)
        self.embedding_dim = int(hidden)
        self.compute_dtype = compute_dtype
        self.out_dtype = out_dtype

        stream_dtype = compute_dtype if compute_dtype is not None else weight.dtype
        in_bytes = np.dtype(stream_dtype).itemsize
        out_bytes = 4 if out_dtype is None else np.dtype(out_dtype).itemsize
        self.m_granule = _m_granule(stream_dtype)

        # Per-generation VMEM budget. v5e/v6e: 128 MiB physical but the default
        # scoped limit is only 16/32 MiB -> raise to ~100 MiB. v7x: 64 MiB per
        # TensorCore -> stay under ~48 MiB so double-buffering survives.
        physical = _vmem_capacity_bytes()
        if physical >= 128 * 1024 * 1024:
            self.vmem_limit = 100 * 1024 * 1024
        else:
            self.vmem_limit = max((physical * 3) // 4, 32 * 1024 * 1024)
        self.vmem_limit = min(self.vmem_limit, physical - 8 * 1024 * 1024)
        budget = self.vmem_limit - 8 * 1024 * 1024  # headroom for internal scratch

        tm, tv, tk = _fit_tiles_to_vmem(
            max(tile_m, self.m_granule), tile_v, tile_k, in_bytes, out_bytes, budget)

        # Prefer tiles dividing the layout-rounded extents (Megatron vocab is
        # normally already a multiple of 128) -> no output padding, no slice copy.
        self.tv = _fit_tile(vocab, tv, 128)
        self.tk = _fit_tile(hidden, tk, 128)
        self.tm_max = tm

        # Cast + zero-pad the weight ONCE here (outside the per-step hot path).
        w = weight if compute_dtype is None else weight.astype(compute_dtype)
        w = _pad_axis(w, 0, _round_up(vocab, self.tv))
        w = _pad_axis(w, 1, _round_up(hidden, self.tk))
        # TODO(synk): optional quantized weight-streaming path (int8 on v5e/v6e,
        # fp8 on v7x) to halve the dominant weight HBM stream beyond bf16.
        self.weight = w

    def __call__(self, x):
        return _vocab_projection_fwd(
            x, self.weight,
            vocab=self.num_embeddings,
            tm_max=self.tm_max, tv=self.tv, tk=self.tk,
            m_granule=self.m_granule,
            out_dtype=self.out_dtype,
            compute_dtype=self.compute_dtype,
            vmem_limit=self.vmem_limit,
        )


def init_weight(key, num_embeddings, embedding_dim, dtype=jnp.float32):
    """Deterministic xavier_normal_ equivalent for weight (vocab, hidden)."""
    std = (2.0 / (num_embeddings + embedding_dim)) ** 0.5
    return (std * jax.random.normal(key, (num_embeddings, embedding_dim))).astype(dtype)


if __name__ == "__main__":
    # Small shapes consistent with the module: seq=8, batch=2, hidden=32, vocab=256.
    seq, batch, hidden, vocab = 8, 2, 32, 256

    key = jax.random.PRNGKey(0)
    k_x, k_w = jax.random.split(key)

    x = jax.random.normal(k_x, (seq, batch, hidden), dtype=jnp.float32)
    weight = init_weight(k_w, vocab, hidden)

    ref = jnp.einsum("sbh,vh->sbv", x, weight)  # F.linear semantics: x @ W.T

    # f32 path -- exact; accumulates directly into the resident output block.
    proj_f32 = VocabParallelProjectionTPU(weight)
    logits = jax.block_until_ready(proj_f32(x))
    assert logits.shape == (seq, batch, vocab)
    assert logits.dtype == jnp.float32
    assert jnp.allclose(logits, ref, atol=1e-5, rtol=1e-5)

    # bf16 streaming + bf16 logits (production HBM-bound config); f32 accumulation.
    # Note: bf16 streaming perturbs logits slightly -- keep the f32 path for
    # loss-sensitive use.
    proj_bf16 = VocabParallelProjectionTPU(
        weight, compute_dtype=jnp.bfloat16, out_dtype=jnp.bfloat16)
    logits_bf16 = jax.block_until_ready(proj_bf16(x))
    assert logits_bf16.shape == (seq, batch, vocab)
    assert logits_bf16.dtype == jnp.bfloat16
    assert jnp.allclose(logits_bf16.astype(jnp.float32), ref, atol=5e-2, rtol=5e-2)

    print("KERNEL_OK")
</pallas_src>

<mosaic_0001>
module attributes {stable_mosaic.version = 11 : i64} {
  func.func @_proj_kernel_f32_out(%arg0: i32, %arg1: i32, %arg2: i32, %arg3: memref<16x128xf32, #tpu.memory_space<vmem>>, %arg4: memref<256x128xf32, #tpu.memory_space<vmem>>, %arg5: memref<16x256xf32, #tpu.memory_space<vmem>>) attributes {dimension_semantics = [#tpu.dimension_semantics<parallel>, #tpu.dimension_semantics<parallel>, #tpu.dimension_semantics<arbitrary>], iteration_bounds = array<i64: 1, 1, 1>, scalar_prefetch = 0 : i64, scratch_operands = 0 : i64, tpu.core_type = #tpu.core_type<tc>, window_params = [{transform_indices = @transform_0, window_bounds = array<i64: 16, 128>}, {transform_indices = @transform_1, window_bounds = array<i64: 256, 128>}, {transform_indices = @transform_2, window_bounds = array<i64: 16, 256>}]} {
    %c0_i32 = arith.constant 0 : i32
    %0 = arith.cmpi eq, %arg2, %c0_i32 : i32
    %1 = arith.extui %0 : i1 to i32
    %c0_i32_0 = arith.constant 0 : i32
    %2 = arith.cmpi ne, %1, %c0_i32_0 : i32
    scf.if %2 {
      %cst_8 = arith.constant 0.000000e+00 : f32
      %9 = vector.broadcast %cst_8 : f32 to vector<16x256xf32>
      %c0_9 = arith.constant 0 : index
      %c0_10 = arith.constant 0 : index
      %10 = vector.load %arg5[%c0_9, %c0_10] : memref<16x256xf32, #tpu.memory_space<vmem>>, vector<16x256xf32>
      tpu.vector_store %arg5[%c0_9, %c0_10], %9 {strides = array<i32>} : memref<16x256xf32, #tpu.memory_space<vmem>>, vector<16x256xf32>,
    } else {
    }
    %c0 = arith.constant 0 : index
    %c0_1 = arith.constant 0 : index
    %3 = vector.load %arg5[%c0, %c0_1] : memref<16x256xf32, #tpu.memory_space<vmem>>, vector<16x256xf32>
    %c0_2 = arith.constant 0 : index
    %c0_3 = arith.constant 0 : index
    %4 = vector.load %arg3[%c0_2, %c0_3] : memref<16x128xf32, #tpu.memory_space<vmem>>, vector<16x128xf32>
    %c0_4 = arith.constant 0 : index
    %c0_5 = arith.constant 0 : index
    %5 = vector.load %arg4[%c0_4, %c0_5] : memref<256x128xf32, #tpu.memory_space<vmem>>, vector<256x128xf32>
    %cst = arith.constant dense<0.000000e+00> : vector<16x256xf32>
    %6 = tpu.matmul %4, %5, %cst {dimension_numbers = #tpu.dot_dimension_numbers<[1], [1], [0], [0], [0, 0, 1, 0], [], []>} : vector<16x128xf32>, vector<256x128xf32>, vector<16x256xf32> -> vector<16x256xf32>
    %7 = arith.addf %3, %6 : vector<16x256xf32>
    %c0_6 = arith.constant 0 : index
    %c0_7 = arith.constant 0 : index
    %8 = vector.load %arg5[%c0_6, %c0_7] : memref<16x256xf32, #tpu.memory_space<vmem>>, vector<16x256xf32>
    tpu.vector_store %arg5[%c0_6, %c0_7], %7 {strides = array<i32>} : memref<16x256xf32, #tpu.memory_space<vmem>>, vector<16x256xf32>,
    return
  }
  func.func @transform_0(%arg0: i32, %arg1: i32, %arg2: i32) -> (i32, i32) {
    %c0_i32 = arith.constant 0 : i32
    return %arg0, %arg2 : i32, i32
  }
  func.func @transform_1(%arg0: i32, %arg1: i32, %arg2: i32) -> (i32, i32) {
    %c0_i32 = arith.constant 0 : i32
    return %arg1, %arg2 : i32, i32
  }
  func.func @transform_2(%arg0: i32, %arg1: i32, %arg2: i32) -> (i32, i32) {
    %c0_i32 = arith.constant 0 : i32
    return %arg0, %arg1 : i32, i32
  }
}

</mosaic_0001>

<bundles_post_ra>
// kernel: _vocab_projection_fwd.1
= control target key start
LH: loop header
LB: loop body
LE: loop exit
PB: predicated region body
PF: predicated region fallthrough
CT: control target
= control target key end

     0   :  { %7 = vsyncpa [#allocation3], 0  ;;  %s194_s12 = smov [#allocation2]   ;;  %s195_s14 = smov 128   ;;  %s233_s0 = inlined_call_operand.vmem [shape: f32[16,128], index: 0, kind: input, shape index: {}]   ;;  %s234_s1 = inlined_call_operand.hbm [shape: f32[256,128], index: 1, kind: input, shape index: {}]   ;;  %s235_s2 = inlined_call_operand.vmem [shape: f32[16,256], index: 2, kind: output, shape index: {}]  }
   0x1   :  { %s14_s11 = sshll.u32 %s234_s1, 4  ;;  %s16_s13 = sshll.u32 %s194_s12, 4  ;;  %s15_s11 = int_to_ptr.hbm [resolvable:$true] %s14_s11  ;;  %s17_s13 = int_to_ptr.vmem [resolvable:$true] %s16_s13 }
   0x2   :  { %s196_s15 = smov 8  }
   0x3   :  { %22 = dma.hbm_to_vmem [thread:$0]  %s15_s11, 4096, %s17_s13, [#allocation3], %s195_s14, %s195_s14, %s196_s15  }
   0x4   :  { %192 = dma.done.wait [#allocation3], 4096  }
   0x5   :  { %193 = vsyncadd [#allocation3], 4294963200  ;;  %v56_v0 = vld [vmem:[#allocation2 + $0x78] sm:$0xff]  ;;  %v55_v2 = vld [vmem:[#allocation2 + $0x70] sm:$0xff] }
   0x6   :  { %v72_v1 = vld [vmem:[#allocation2 + $0xf8] sm:$0xff]  ;;  %132 = vmatpush.xpose.msra.mxu2 %v56_v0  ;;  %v71_v3 = vld [vmem:[#allocation2 + $0xf0] sm:$0xff]  ;;  %73 = vmatpush.xpose.msra.mxu0 %v56_v0  ;;  %v54_v4 = vld [vmem:[#allocation2 + $0x68] sm:$0xff] }
   0x7   :  { %148 = vmatpush.xpose.msra.mxu3 %v72_v1  ;;  %96 = vmatpush.xpose.msra.mxu1 %v72_v1  ;;  %v70_v5 = vld [vmem:[#allocation2 + $0xe8] sm:$0xff]  ;;  %v53_v6 = vld [vmem:[#allocation2 + $0x60] sm:$0xff]  ;;  %v52_v8 = vld [vmem:[#allocation2 + $0x58] sm:$0xff] }
   0x8   :  { %v69_v7 = vld [vmem:[#allocation2 + $0xe0] sm:$0xff]  ;;  %v68_v9 = vld [vmem:[#allocation2 + $0xd8] sm:$0xff]  ;;  %v51_v10 = vld [vmem:[#allocation2 + $0x50] sm:$0xff] }
   0x9   :  { %v67_v11 = vld [vmem:[#allocation2 + $0xd0] sm:$0xff]  ;;  %v50_v12 = vld [vmem:[#allocation2 + $0x48] sm:$0xff]  ;;  %v49_v14 = vld [vmem:[#allocation2 + $0x40] sm:$0xff] }
   0xa   :  { %133 = vmatpush.xpose.msra.mxu2 %v55_v2  ;;  %74 = vmatpush.xpose.msra.mxu0 %v55_v2  ;;  %v66_v13 = vld [vmem:[#allocation2 + $0xc8] sm:$0xff]  ;;  %v65_v15 = vld [vmem:[#allocation2 + $0xc0] sm:$0xff]  ;;  %v48_v16 = vld [vmem:[#allocation2 + $0x38] sm:$0xff] }
   0xb   :  { %149 = vmatpush.xpose.msra.mxu3 %v71_v3  ;;  %97 = vmatpush.xpose.msra.mxu1 %v71_v3  ;;  %v64_v17 = vld [vmem:[#allocation2 + $0xb8] sm:$0xff]  ;;  %v47_v18 = vld [vmem:[#allocation2 + $0x30] sm:$0xff]  ;;  %v46_v20 = vld [vmem:[#allocation2 + $0x28] sm:$0xff] }
   0xc   :  { %v63_v19 = vld [vmem:[#allocation2 + $0xb0] sm:$0xff]  ;;  %v62_v21 = vld [vmem:[#allocation2 + $0xa8] sm:$0xff]  ;;  %v45_v22 = vld [vmem:[#allocation2 + $0x20] sm:$0xff] }
   0xd   :  { %v61_v23 = vld [vmem:[#allocation2 + $0xa0] sm:$0xff]  ;;  %v44_v24 = vld [vmem:[#allocation2 + $0x18] sm:$0xff]  ;;  %v43_v26 = vld [vmem:[#allocation2 + $0x10] sm:$0xff] }
   0xe   :  { %134 = vmatpush.xpose.msra.mxu2 %v54_v4  ;;  %75 = vmatpush.xpose.msra.mxu0 %v54_v4  ;;  %v60_v25 = vld [vmem:[#allocation2 + $0x98] sm:$0xff]  ;;  %v59_v27 = vld [vmem:[#allocation2 + $0x90] sm:$0xff]  ;;  %v42_v28 = vld [vmem:[#allocation2 + $0x8] sm:$0xff] }
   0xf   :  { %150 = vmatpush.xpose.msra.mxu3 %v70_v5  ;;  %98 = vmatpush.xpose.msra.mxu1 %v70_v5  ;;  %v58_v29 = vld [vmem:[#allocation2 + $0x88] sm:$0xff]  ;;  %v41_v30 = vld [vmem:[#allocation2] sm:$0xff] }
  0x10   :  { %v57_v31 = vld [vmem:[#allocation2 + $0x80] sm:$0xff]  ;;  %v40_v32 = vld [vmem:[%s233_s0 + $0x8] sm:$0xff] }
  0x11   :  { %v39_v33 = vld [vmem:[%s233_s0] sm:$0xff] }
  0x12   :  { %135 = vmatpush.xpose.msra.mxu2 %v53_v6  ;;  %76 = vmatpush.xpose.msra.mxu0 %v53_v6 }
  0x13   :  { %151 = vmatpush.xpose.msra.mxu3 %v69_v7  ;;  %99 = vmatpush.xpose.msra.mxu1 %v69_v7 }
  0x16   :  { %136 = vmatpush.xpose.msra.mxu2 %v52_v8  ;;  %77 = vmatpush.xpose.msra.mxu0 %v52_v8 }
  0x17   :  { %152 = vmatpush.xpose.msra.mxu3 %v68_v9  ;;  %100 = vmatpush.xpose.msra.mxu1 %v68_v9 }
  0x1a   :  { %137 = vmatpush.xpose.msra.mxu2 %v51_v10  ;;  %78 = vmatpush.xpose.msra.mxu0 %v51_v10 }
  0x1b   :  { %153 = vmatpush.xpose.msra.mxu3 %v67_v11  ;;  %101 = vmatpush.xpose.msra.mxu1 %v67_v11 }
  0x1e   :  { %138 = vmatpush.xpose.msra.mxu2 %v50_v12  ;;  %79 = vmatpush.xpose.msra.mxu0 %v50_v12 }
  0x1f   :  { %154 = vmatpush.xpose.msra.mxu3 %v66_v13  ;;  %102 = vmatpush.xpose.msra.mxu1 %v66_v13 }
  0x22   :  { %139 = vmatpush.xpose.msra.mxu2 %v49_v14  ;;  %80 = vmatpush.xpose.msra.mxu0 %v49_v14 }
  0x23   :  { %155 = vmatpush.xpose.msra.mxu3 %v65_v15  ;;  %103 = vmatpush.xpose.msra.mxu1 %v65_v15 }
  0x26   :  { %140 = vmatpush.xpose.msra.mxu2 %v48_v16  ;;  %81 = vmatpush.xpose.msra.mxu0 %v48_v16 }
  0x27   :  { %156 = vmatpush.xpose.msra.mxu3 %v64_v17  ;;  %104 = vmatpush.xpose.msra.mxu1 %v64_v17 }
  0x2a   :  { %141 = vmatpush.xpose.msra.mxu2 %v47_v18  ;;  %82 = vmatpush.xpose.msra.mxu0 %v47_v18 }
  0x2b   :  { %157 = vmatpush.xpose.msra.mxu3 %v63_v19  ;;  %105 = vmatpush.xpose.msra.mxu1 %v63_v19 }
  0x2e   :  { %142 = vmatpush.xpose.msra.mxu2 %v46_v20  ;;  %83 = vmatpush.xpose.msra.mxu0 %v46_v20 }
  0x2f   :  { %158 = vmatpush.xpose.msra.mxu3 %v62_v21  ;;  %106 = vmatpush.xpose.msra.mxu1 %v62_v21 }
  0x32   :  { %143 = vmatpush.xpose.msra.mxu2 %v45_v22  ;;  %84 = vmatpush.xpose.msra.mxu0 %v45_v22 }
  0x33   :  { %159 = vmatpush.xpose.msra.mxu3 %v61_v23  ;;  %107 = vmatpush.xpose.msra.mxu1 %v61_v23 }
  0x36   :  { %144 = vmatpush.xpose.msra.mxu2 %v44_v24  ;;  %85 = vmatpush.xpose.msra.mxu0 %v44_v24 }
  0x37   :  { %160 = vmatpush.xpose.msra.mxu3 %v60_v25  ;;  %108 = vmatpush.xpose.msra.mxu1 %v60_v25 }
  0x3a   :  { %145 = vmatpush.xpose.msra.mxu2 %v43_v26  ;;  %86 = vmatpush.xpose.msra.mxu0 %v43_v26 }
  0x3b   :  { %161 = vmatpush.xpose.msra.mxu3 %v59_v27  ;;  %109 = vmatpush.xpose.msra.mxu1 %v59_v27 }
  0x3e   :  { %146 = vmatpush.xpose.msra.mxu2 %v42_v28  ;;  %87 = vmatpush.xpose.msra.mxu0 %v42_v28 }
  0x3f   :  { %162 = vmatpush.xpose.msra.mxu3 %v58_v29  ;;  %110 = vmatpush.xpose.msra.mxu1 %v58_v29 }
  0x42   :  { %147 = vmatpush.xpose.msra.mxu2 %v41_v30  ;;  %88 = vmatpush.xpose.msra.mxu0 %v41_v30 }
  0x43   :  { %163 = vmatpush.xpose.msra.mxu3 %v57_v31  ;;  %111 = vmatpush.xpose.msra.mxu1 %v57_v31 }
  0x45   :  { %92 = vmatmul.f32.vlgmr.msra.gmra.mxu2 %v40_v32  ;;  %89 = vmatmul.f32.vlgmr.msra.gmra.mxu0 %v39_v33 }
  0x46   :  { %115 = vmatmul.f32.vlgmr.msra.gmra.mxu3 %v40_v32  ;;  %112 = vmatmul.f32.vlgmr.msra.gmra.mxu1 %v39_v33 }
  0xc2   :  { %v90_v34 = vpop.f32.mrf.mxu0 }
  0xc3   :  { %v113_v35 = vpop.f32.mrf.mxu1  ;;  %123 = vst [vmem:[%s235_s2] sm:$0xff] %v90_v34 }
  0xc4   :  { %124 = vst [vmem:[%s235_s2 + $0x8] sm:$0xff] %v113_v35 }
  0xc8   :  { %v93_v36 = vpop.f32.mrf.mxu2 }
  0xc9   :  { %v116_v37 = vpop.f32.mrf.mxu3  ;;  %125 = vst [vmem:[%s235_s2 + $0x10] sm:$0xff] %v93_v36 }
  0xca   :  { %126 = vst [vmem:[%s235_s2 + $0x18] sm:$0xff] %v116_v37 }
  0xcb   :  { %131 = vsyncpa [#allocation3], 1 }

</bundles_post_ra>
